<compile_context>
chip_gen: v7x
topology: tpu7x:2x2x1
jax: 0.10.0
libtpu: 0.0.40
codegen_flags: <defaults>
</compile_context>

<pallas_src>
import functools
import math

import jax
import jax.numpy as jnp
from jax.experimental import pallas as pl
from jax.experimental.pallas import tpu as pltpu


def _round_up(n, m):
    return ((n + m - 1) // m) * m


def _attention_kernel(x_ref, wqkv_ref, bqkv_ref, score_ref, weight_ref, *, d_k):
    bt, S, E = x_ref.shape
    Dp = score_ref.shape[-1]   # d_k padded to a multiple of 128
    Sp = weight_ref.shape[-1]  # S   padded to a multiple of 128

    # ---- Fused Q/K/V projection: one bf16 MXU matmul, f32 accumulate. ----
    x2d = x_ref[...].reshape(bt * S, E)                              # bf16
    qkv = jnp.dot(x2d, wqkv_ref[...],
                  preferred_element_type=jnp.float32)                # (bt*S, 2*d_k+Dp)
    qkv = qkv + bqkv_ref[...]                                        # single bias add (f32)
    qkv = qkv.reshape(bt, S, 2 * d_k + Dp)

    q = qkv[:, :, :d_k]              # already scaled by 1/sqrt(d_k) (folded in wrapper)
    k = qkv[:, :, d_k:2 * d_k]       # (bt, S, d_k)
    v = qkv[:, :, 2 * d_k:]          # (bt, S, Dp); columns >= d_k are exactly 0

    # Zero-pad the key axis to Sp (tile-aligned sublane concat) so the matmuls
    # and output stores below are all lane-dense.
    if Sp > S:
        k = jnp.concatenate([k, jnp.zeros((bt, Sp - S, d_k), jnp.float32)], axis=1)
        v = jnp.concatenate([v, jnp.zeros((bt, Sp - S, Dp), jnp.float32)], axis=1)

    # logit[b, i, j] = <q_i, k_j>   (scale pre-folded; padded key columns -> 0)
    logit = jnp.einsum("bqd,bkd->bqk", q, k,
                       preferred_element_type=jnp.float32)           # (bt, S, Sp)

    # TODO(synk): optional additive mask (mask * -1e9) not wired in; module default mask=None.

    # Softmax over the *query* axis (PyTorch dim=1), in f32.  Padded key columns
    # produce harmless values that multiply zero V rows / get sliced off.
    m = jnp.max(logit, axis=1, keepdims=True)                        # (bt, 1, Sp)
    p = jnp.exp(logit - m)
    denom = jnp.sum(p, axis=1, keepdims=True)
    attn_weight = p * pl.reciprocal(denom, approx=True)              # (bt, S, Sp)

    attn_score = jnp.einsum("bqk,bkd->bqd", attn_weight, v,
                            preferred_element_type=jnp.float32)      # (bt, S, Dp)

    score_ref[...] = attn_score.astype(score_ref.dtype)              # full-width store
    weight_ref[...] = attn_weight.astype(weight_ref.dtype)           # full-width store


def attention_layer(x, wq, bq, wk, bk, wv, bv, *, bt=None):
    """x: (B, S, E) f32. wq/wk/wv: (d_k, E) PyTorch Linear weights; bq/bk/bv: (d_k,).
    Returns (attn_score (B, S, d_k) f32, attn_weight (B, S, S) f32)."""
    B, S, E = x.shape
    d_k = wq.shape[0]
    Dp = _round_up(d_k, 128)
    Sp = _round_up(S, 128)

    if bt is None:
        # Amortize per-grid-step pipeline overhead, but keep >=2 parallel grid
        # steps whenever B >= 2 so both v7x TensorCores are used.
        bt = 1 if B < 2 else max(d for d in range(1, B // 2 + 1) if B % d == 0)

    scale = 1.0 / math.sqrt(d_k)

    # Fused, pre-transposed projection weight: [ W_q^T*scale | W_k^T | W_v^T padded to Dp ]
    wv_pad = jnp.zeros((E, Dp), jnp.float32).at[:, :d_k].set(wv.T)
    wqkv = jnp.concatenate([wq.T * scale, wk.T, wv_pad], axis=1).astype(jnp.bfloat16)
    bv_pad = jnp.zeros((Dp,), jnp.float32).at[:d_k].set(bv)
    bqkv = jnp.concatenate([bq * scale, bk, bv_pad]).reshape(1, 2 * d_k + Dp)
    bqkv = bqkv.astype(jnp.float32)

    x_bf16 = x.astype(jnp.bfloat16)   # bf16 MXU operands; halves HBM read of x

    grid_spec = pltpu.PrefetchScalarGridSpec(
        num_scalar_prefetch=0,
        grid=(B // bt,),
        in_specs=[
            pl.BlockSpec((bt, S, E), lambda b: (b, 0, 0)),
            pl.BlockSpec((E, 2 * d_k + Dp), lambda b: (0, 0)),
            pl.BlockSpec((1, 2 * d_k + Dp), lambda b: (0, 0)),
        ],
        out_specs=[
            pl.BlockSpec((bt, S, Dp), lambda b: (b, 0, 0)),
            pl.BlockSpec((bt, S, Sp), lambda b: (b, 0, 0)),
        ],
    )

    score_p, weight_p = pl.pallas_call(
        functools.partial(_attention_kernel, d_k=d_k),
        out_shape=(
            jax.ShapeDtypeStruct((B, S, Dp), jnp.float32),
            jax.ShapeDtypeStruct((B, S, Sp), jnp.float32),
        ),
        grid_spec=grid_spec,
        compiler_params=pltpu.CompilerParams(
            dimension_semantics=("parallel",)),
    )(x_bf16, wqkv, bqkv)

    # Slice the lane padding back off.
    return score_p[:, :, :d_k], weight_p[:, :, :S]


def _reference(x, wq, bq, wk, bk, wv, bv):
    """f32 reference matching the PyTorch module; projection operands are rounded
    to bf16 exactly like the kernel so the comparison isolates kernel errors."""
    d_k = wq.shape[0]
    scale = 1.0 / math.sqrt(d_k)
    xb = x.astype(jnp.bfloat16).astype(jnp.float32)
    wqb = (wq.T * scale).astype(jnp.bfloat16).astype(jnp.float32)
    wkb = wk.T.astype(jnp.bfloat16).astype(jnp.float32)
    wvb = wv.T.astype(jnp.bfloat16).astype(jnp.float32)
    q = jnp.einsum("bse,ed->bsd", xb, wqb) + bq * scale
    k = jnp.einsum("bse,ed->bsd", xb, wkb) + bk
    v = jnp.einsum("bse,ed->bsd", xb, wvb) + bv
    logit = jnp.einsum("bqd,bkd->bqk", q, k)     # scale already folded into q
    w = jax.nn.softmax(logit, axis=1)            # PyTorch softmax(dim=1)
    return jnp.einsum("bqk,bkd->bqd", w, v), w


if __name__ == "__main__":
    # Small shapes consistent with the module: B=2, S=8, embed_d=32, n_heads=4 -> d_k=8
    B, S, E, n_heads = 2, 8, 32, 4
    d_k = E // n_heads

    key = jax.random.PRNGKey(0)
    kx, kq, kbq, kk, kbk, kv, kbv = jax.random.split(key, 7)

    x = jax.random.normal(kx, (B, S, E), dtype=jnp.float32)

    bound = 1.0 / math.sqrt(E)
    uni = lambda k, shape: jax.random.uniform(
        k, shape, minval=-bound, maxval=bound, dtype=jnp.float32)
    wq, bq = uni(kq, (d_k, E)), uni(kbq, (d_k,))
    wk, bk = uni(kk, (d_k, E)), uni(kbk, (d_k,))
    wv, bv = uni(kv, (d_k, E)), uni(kbv, (d_k,))

    score, weight = attention_layer(x, wq, bq, wk, bk, wv, bv)
    jax.block_until_ready((score, weight))

    ref_score, ref_weight = _reference(x, wq, bq, wk, bk, wv, bv)
    # bf16 MXU operands + approx reciprocal -> relaxed tolerance.
    assert jnp.allclose(score, ref_score, atol=2e-2, rtol=2e-2), "attn_score mismatch"
    assert jnp.allclose(weight, ref_weight, atol=2e-2, rtol=2e-2), "attn_weight mismatch"

    print("KERNEL_OK")
</pallas_src>

<mosaic_0001>
module attributes {stable_mosaic.version = 11 : i64} {
  func.func @_attention_kernel(%arg0: i32, %arg1: memref<1x8x32xbf16, #tpu.memory_space<vmem>>, %arg2: memref<32x144xbf16, #tpu.memory_space<vmem>>, %arg3: memref<1x144xf32, #tpu.memory_space<vmem>>, %arg4: memref<1x8x128xf32, #tpu.memory_space<vmem>>, %arg5: memref<1x8x128xf32, #tpu.memory_space<vmem>>) attributes {dimension_semantics = [#tpu.dimension_semantics<parallel>], iteration_bounds = array<i64: 2>, scalar_prefetch = 0 : i64, scratch_operands = 0 : i64, tpu.core_type = #tpu.core_type<tc>, window_params = [{transform_indices = @transform_0, window_bounds = array<i64: 1, 8, 32>}, {pipeline_mode = #tpu.pipeline_mode<synchronous>, transform_indices = @transform_1, window_bounds = array<i64: 32, 144>}, {pipeline_mode = #tpu.pipeline_mode<synchronous>, transform_indices = @transform_2, window_bounds = array<i64: 1, 144>}, {transform_indices = @transform_3, window_bounds = array<i64: 1, 8, 128>}, {transform_indices = @transform_4, window_bounds = array<i64: 1, 8, 128>}]} {
    %c0 = arith.constant 0 : index
    %c0_0 = arith.constant 0 : index
    %c0_1 = arith.constant 0 : index
    %0 = vector.load %arg1[%c0, %c0_0, %c0_1] : memref<1x8x32xbf16, #tpu.memory_space<vmem>>, vector<1x8x32xbf16>
    %1 = vector.shape_cast %0 : vector<1x8x32xbf16> to vector<8x32xbf16>
    %c0_2 = arith.constant 0 : index
    %c0_3 = arith.constant 0 : index
    %2 = vector.load %arg2[%c0_2, %c0_3] : memref<32x144xbf16, #tpu.memory_space<vmem>>, vector<32x144xbf16>
    %cst = arith.constant dense<0.000000e+00> : vector<8x144xf32>
    %3 = tpu.matmul %1, %2, %cst {dimension_numbers = #tpu.dot_dimension_numbers<[1], [0], [0], [1], [0, 0, 1, 1], [], []>} : vector<8x32xbf16>, vector<32x144xbf16>, vector<8x144xf32> -> vector<8x144xf32>
    %c0_4 = arith.constant 0 : index
    %c0_5 = arith.constant 0 : index
    %4 = vector.load %arg3[%c0_4, %c0_5] : memref<1x144xf32, #tpu.memory_space<vmem>>, vector<1x144xf32>
    %5 = vector.broadcast %4 : vector<1x144xf32> to vector<8x144xf32>
    %6 = arith.addf %3, %5 : vector<8x144xf32>
    %7 = vector.shape_cast %6 : vector<8x144xf32> to vector<1x8x144xf32>
    %8 = vector.extract_strided_slice %7 {offsets = [0, 0, 0], sizes = [1, 8, 8], strides = [1, 1, 1]} : vector<1x8x144xf32> to vector<1x8x8xf32>
    %9 = vector.extract_strided_slice %7 {offsets = [0, 0, 8], sizes = [1, 8, 8], strides = [1, 1, 1]} : vector<1x8x144xf32> to vector<1x8x8xf32>
    %10 = vector.extract_strided_slice %7 {offsets = [0, 0, 16], sizes = [1, 8, 128], strides = [1, 1, 1]} : vector<1x8x144xf32> to vector<1x8x128xf32>
    %cst_6 = arith.constant 0.000000e+00 : f32
    %11 = vector.broadcast %cst_6 : f32 to vector<1x120x8xf32>
    %12 = tpu.concatenate %9, %11 in 1 : vector<1x8x8xf32>, vector<1x120x8xf32> -> vector<1x128x8xf32>
    %cst_7 = arith.constant 0.000000e+00 : f32
    %13 = vector.broadcast %cst_7 : f32 to vector<1x120x128xf32>
    %14 = tpu.concatenate %10, %13 in 1 : vector<1x8x128xf32>, vector<1x120x128xf32> -> vector<1x128x128xf32>
    "tpu.trace_start"() <{level = 10 : i32, message = "bqd,bkd->bqk"}> : () -> ()
    %cst_8 = arith.constant dense<0.000000e+00> : vector<1x8x128xf32>
    %15 = tpu.matmul %8, %12, %cst_8 {dimension_numbers = #tpu.dot_dimension_numbers<[2], [2], [1], [1], [0, 0, 0, 1, 1, 1], [0], [0]>} : vector<1x8x8xf32>, vector<1x128x8xf32>, vector<1x8x128xf32> -> vector<1x8x128xf32>
    "tpu.trace_stop"() : () -> ()
    %cst_9 = arith.constant dense<0xFF800000> : vector<1x128xf32>
    %16 = vector.multi_reduction <maximumf>, %15, %cst_9 [1] : vector<1x8x128xf32> to vector<1x128xf32>
    %17 = vector.shape_cast %16 : vector<1x128xf32> to vector<1x1x128xf32>
    %18 = vector.broadcast %17 : vector<1x1x128xf32> to vector<1x8x128xf32>
    %19 = arith.subf %15, %18 : vector<1x8x128xf32>
    %20 = math.exp %19 : vector<1x8x128xf32>
    %cst_10 = arith.constant dense<0.000000e+00> : vector<1x128xf32>
    %21 = vector.multi_reduction <add>, %20, %cst_10 [1] : vector<1x8x128xf32> to vector<1x128xf32>
    %22 = vector.shape_cast %21 : vector<1x128xf32> to vector<1x1x128xf32>
    %23 = tpu.reciprocal %22 {approx = true} : vector<1x1x128xf32> -> vector<1x1x128xf32>
    %24 = vector.broadcast %23 : vector<1x1x128xf32> to vector<1x8x128xf32>
    %25 = arith.mulf %20, %24 : vector<1x8x128xf32>
    "tpu.trace_start"() <{level = 10 : i32, message = "bqk,bkd->bqd"}> : () -> ()
    %cst_11 = arith.constant dense<0.000000e+00> : vector<1x8x128xf32>
    %26 = tpu.matmul %25, %14, %cst_11 {dimension_numbers = #tpu.dot_dimension_numbers<[2], [1], [1], [2], [0, 0, 0, 1, 1, 2], [0], [0]>} : vector<1x8x128xf32>, vector<1x128x128xf32>, vector<1x8x128xf32> -> vector<1x8x128xf32>
    "tpu.trace_stop"() : () -> ()
    %c0_12 = arith.constant 0 : index
    %c0_13 = arith.constant 0 : index
    %c0_14 = arith.constant 0 : index
    %27 = vector.load %arg4[%c0_12, %c0_13, %c0_14] : memref<1x8x128xf32, #tpu.memory_space<vmem>>, vector<1x8x128xf32>
    tpu.vector_store %arg4[%c0_12, %c0_13, %c0_14], %26 {strides = array<i32>} : memref<1x8x128xf32, #tpu.memory_space<vmem>>, vector<1x8x128xf32>,
    %c0_15 = arith.constant 0 : index
    %c0_16 = arith.constant 0 : index
    %c0_17 = arith.constant 0 : index
    %28 = vector.load %arg5[%c0_15, %c0_16, %c0_17] : memref<1x8x128xf32, #tpu.memory_space<vmem>>, vector<1x8x128xf32>
    tpu.vector_store %arg5[%c0_15, %c0_16, %c0_17], %25 {strides = array<i32>} : memref<1x8x128xf32, #tpu.memory_space<vmem>>, vector<1x8x128xf32>,
    return
  }
  func.func @transform_0(%arg0: i32) -> (i32, i32, i32) {
    %c0_i32 = arith.constant 0 : i32
    %c0_i32_0 = arith.constant 0 : i32
    %c0_i32_1 = arith.constant 0 : i32
    return %arg0, %c0_i32, %c0_i32_0 : i32, i32, i32
  }
  func.func @transform_1(%arg0: i32) -> (i32, i32) {
    %c0_i32 = arith.constant 0 : i32
    %c0_i32_0 = arith.constant 0 : i32
    %c0_i32_1 = arith.constant 0 : i32
    return %c0_i32, %c0_i32_0 : i32, i32
  }
  func.func @transform_2(%arg0: i32) -> (i32, i32) {
    %c0_i32 = arith.constant 0 : i32
    %c0_i32_0 = arith.constant 0 : i32
    %c0_i32_1 = arith.constant 0 : i32
    return %c0_i32, %c0_i32_0 : i32, i32
  }
  func.func @transform_3(%arg0: i32) -> (i32, i32, i32) {
    %c0_i32 = arith.constant 0 : i32
    %c0_i32_0 = arith.constant 0 : i32
    %c0_i32_1 = arith.constant 0 : i32
    return %arg0, %c0_i32, %c0_i32_0 : i32, i32, i32
  }
  func.func @transform_4(%arg0: i32) -> (i32, i32, i32) {
    %c0_i32 = arith.constant 0 : i32
    %c0_i32_0 = arith.constant 0 : i32
    %c0_i32_1 = arith.constant 0 : i32
    return %arg0, %c0_i32, %c0_i32_0 : i32, i32, i32
  }
}

</mosaic_0001>

<bundles_post_ra>
// kernel: tpu_custom_call.1
= control target key start
LH: loop header
LB: loop body
LE: loop exit
PB: predicated region body
PF: predicated region fallthrough
CT: control target
= control target key end

     0   :  { %10 = vsyncpa [#allocation3], 0  ;;  %s1391_s0 = inlined_call_operand.hbm [shape: bf16[2,8,32], index: 0, kind: input, shape index: {}]   ;;  %s1392_s1 = inlined_call_operand.hbm [shape: bf16[32,144], index: 1, kind: input, shape index: {}]   ;;  %s1393_s2 = inlined_call_operand.vmem [shape: f32[1,144], index: 2, kind: input, shape index: {}]   ;;  %s1394_s3 = inlined_call_operand.hbm [shape: f32[2,8,128], index: 3, kind: output, shape index: {0}]   ;;  %s1395_s4 = inlined_call_operand.hbm [shape: f32[2,8,128], index: 4, kind: output, shape index: {1}]  }
   0x1   :  { %12 = vsyncpa [#allocation3 + $0x1], 0 }
   0x2   :  { %13 = vsyncpa [#allocation6], 0 }
   0x3   :  { %14 = vsyncpa [#allocation4], 0 }
   0x4   :  { %16 = vsyncpa [#allocation4 + $0x1], 0 }
   0x5   :  { %17 = vsyncpa [#allocation9], 0 }
   0x6   :  { %19 = vsyncpa [#allocation9 + $0x1], 0  ;;  %s1137_s15 = smov 0   ;;  %s1139_s16 = smov 0  }
   0x7   :  { %s1141_s17 = smov 0   ;;  %s1143_s18 = smov 0  }
   0x8 LB: > { %s1158_s19 = sadd.s32 4294967295, %s1098_s18   ;;  %s649_s20 = sadd.s32 4294967294, %s1098_s18   ;;  %s1098_s18 = sphi %s1143_s18, %s1417_s18   ;;  %s1094_s17 = sphi %s1141_s17, %s1416_s17   ;;  %s1090_s16 = sphi %s1139_s16, %s1415_s16   ;;  %s1086_s15 = sphi %s1137_s15, %s1414_s15  }
   0x9   : > { %p45_p0 = scmp.ne.s32.totalorder %s1090_s16, %s1086_s15  ;;  %p1396_p1 = scmp.eq.s32.totalorder %s1158_s19, 0 }
   0xa   : > { %p117_p3 = scmp.eq.s32.totalorder %s649_s20, 1  ;;  %p650_p5 = scmp.ge.s32.totalorder %s1098_s18, 1 }
   0xb   : > { %p1167_p4 = por %p1396_p1, %p45_p0  ;;  %p150_p7 = scmp.lt.s32.totalorder %s1098_s18, 3 }
   0xc   : > { %p1172_p6 = por %p117_p3, %p45_p0  ;;  %s1100_s24 = smov [#allocation5]  }
   0xd   : > { %s1399_s21 = scalar_select %p1167_p4, 1, 0 }
   0xe   : > { %s1400_s22 = scalar_select %p1172_p6, 1, 0 }
   0xf   : > { %p1177_p8 = pnand %p650_p5, %p150_p7  ;;  %s162_s25 = sshll.u32 %s1100_s24, 4  ;;  %s1181_s25 = int_to_ptr.vmem [resolvable:$true] %s162_s25 }
  0x10   : > { %s1193_s27 = sadd.s32 1, %s1098_s18   ;;  %s32_s28 = sadd.s32 1, %s1094_s17 }
  0x11   : > { %s1401_s23 = scalar_select %p1177_p8, 1, 0 }
  0x12   : > { %p858_p9 = pneg %p1177_p8  ;;  %s29_s29 = ssub.s32 %s1098_s18, %s1193_s27 }
  0x13   : > { %s938_s6 = scalar_lea.hbm %s1392_s1, 512 }
  0x14   : > { %p1188_p11 = pnand %p858_p9, %p1396_p1  ;;  %p939_p12 = scmp.ne.s32.totalorder %s1392_s1, %s938_s6 }
  0x15   : > { %p945_p5 = scmp.lt.u32.totalorder %s938_s6, %s1392_s1 }
  0x16   : > { %p940_p13 = pneg %p1188_p11 }
  0x18   : > { %p941_p0 = pnand %p940_p13, %p939_p12 }
  0x1a   : > { %p942_p3 = pneg %p941_p0 }
  0x1c   : > { %p947_p7 = pnand %p945_p5, %p942_p3 }
  0x1e   : > { %950 = shalt.err (!%p947_p7)
}
  0x1f   : > { %s951_s11 = scalar_lea.vmem %s1181_s25, 512  ;;  %p959_p2 = scmp.lt.s32.totalorder %s1181_s25, %s1181_s25 }
  0x20   : > { %p952_p9 = scmp.ne.s32.totalorder %s1181_s25, %s951_s11  ;;  %p960_p6 = scmp.lt.s32.totalorder %s951_s11, %s951_s11 }
  0x22   : > { %p954_p10 = pnand %p952_p9, %p940_p13  ;;  %p961_p4 = por %p960_p6, %p959_p2 }
  0x24   : > { %p955_p1 = pneg %p954_p10 }
  0x26   : > { %p962_p8 = pnand %p961_p4, %p955_p1 }
  0x28   : > { %965 = shalt.err (!%p962_p8)
}
  0x29   : > { %s1101_s12 = smov 128   ;;  %s1102_s13 = smov 8  }
  0x2a   : > { %861 = dma.hbm_to_vmem [thread:$0]  (!%p1188_p11), %s1392_s1, 512, %s1181_s25, [#allocation6], %s1101_s12, %s1101_s12, %s1102_s13  }
  0x2b   : > { %p30_p2 = scmp.eq.s32.totalorder %s29_s29, 0  ;;  %p39_p1 = scmp.ne.s32.totalorder %s1094_s17, %s1090_s16 }
  0x2c   : > { %p40_p4 = scmp.eq.s32.totalorder %s1098_s18, 0  ;;  %p874_p6 = scmp.lt.s32.totalorder %s1098_s18, 2 }
  0x2d   : > { %s1224_s24 = scalar_select %p30_p2, %s1094_s17, %s32_s28  }
  0x2e   : > { %p41_p8 = por %p40_p4, %p39_p1  ;;  %p1403_p10 = scmp.eq.s32.totalorder %s1158_s19, 1 }
  0x2f   : > { %s179_s5 = sand.u32 1, %s1094_s17   ;;  %s654_s6 = sshll.u32 %s1098_s18, 6 }
  0x30   : > { %p1228_p12 = por %p1403_p10, %p39_p1  ;;  %s653_s7 = sshll.u32 %s179_s5, 2 }
  0x31   : > { %s1237_s9 = scalar_lea.hbm %s1391_s0, %s654_s6  ;;  %s183_s25 = scalar_lea.vmem [#allocation2], %s653_s7 }
  0x32   : > { %s190_s28 = sshll.u32 %s183_s25, 4  ;;  %p1239_p11 = pnand %p874_p6, %p41_p8  ;;  %s1243_s28 = int_to_ptr.vmem [resolvable:$true] %s190_s28 }
  0x33   : > { %s180_s10 = scalar_lea.sflag [#allocation3], %s179_s5  ;;  %s966_s11 = scalar_lea.hbm %s1237_s9, 64 }
  0x34   : > { %p967_p13 = scmp.ne.s32.totalorder %s1237_s9, %s966_s11  ;;  %p968_p0 = pneg %p1239_p11 }
  0x35   : > { %s971_s14 = scalar_lea.hbm %s1391_s0, 128  ;;  %p972_p7 = scmp.lt.u32.totalorder %s1237_s9, %s1391_s0 }
  0x36   : > { %p969_p3 = pnand %p968_p0, %p967_p13  ;;  %p973_p9 = scmp.lt.u32.totalorder %s971_s14, %s966_s11 }
  0x37   : > { %p975_p1 = scmp.lt.u32.totalorder %s966_s11, %s1237_s9 }
  0x38   : > { %p970_p5 = pneg %p969_p3  ;;  %p974_p2 = por %p973_p9, %p972_p7 }
  0x3a   : > { %p976_p4 = por %p975_p1, %p974_p2 }
  0x3c   : > { %p977_p6 = pnand %p976_p4, %p970_p5 }
  0x3e   : > { %980 = shalt.err (!%p977_p6)
}
  0x3f   : > { %s981_s5 = scalar_lea.vmem %s1243_s28, 64  ;;  %s1103_s7 = smov [#allocation2]  }
  0x40   : > { %p982_p8 = scmp.ne.s32.totalorder %s1243_s28, %s981_s5  ;;  %s986_s26 = sshll.u32 %s1103_s7, 4  ;;  %s987_s26 = int_to_ptr.vmem [resolvable:$false] %s986_s26 }
  0x41   : > { %s988_s8 = scalar_lea.vmem %s987_s26, 128  ;;  %p989_p3 = scmp.lt.s32.totalorder %s1243_s28, %s987_s26 }
  0x42   : > { %p984_p10 = pnand %p982_p8, %p968_p0  ;;  %p990_p7 = scmp.lt.s32.totalorder %s988_s8, %s981_s5 }
  0x44   : > { %p985_p13 = pneg %p984_p10  ;;  %p991_p9 = por %p990_p7, %p989_p3 }
  0x46   : > { %p992_p2 = pnand %p991_p9, %p985_p13 }
  0x48   : > { %995 = shalt.err (!%p992_p2)
}
  0x49   : > { %865 = dma.hbm_to_vmem [thread:$0]  (!%p1239_p11), %s1237_s9, 64, %s1243_s28, %s180_s10  }
  0x4a   : > { %p1406_p5 = scmp.ne.s32.totalorder %s1401_s23, 0 }
  0x4b   : > { %s1273_s25 = sand.u32 (!%p1406_p5), 1, %s1090_s16   ;;  %p1407_p0 = scmp.ne.s32.totalorder (!%p1406_p5), %s1399_s21, 0 }
  0x4c   : > { %199 = sbr.rel (%p1406_p5) target bundleno = 984 (0x3d8), region = 32  ;;  %s656_s11 = sshll.u32 (!%p1406_p5), %s1273_s25, 2 }
  0x4d   : > { %s202_s12 = scalar_lea.sflag (!%p1406_p5), [#allocation3], %s1273_s25  ;;  %s205_s13 = scalar_lea.vmem (!%p1406_p5), [#allocation2], %s656_s11 }
  0x53   : > { %1069 = dma.done.wait (%p1407_p0), %s202_s12, 64  }
  0x54   : > { %1071 = vsyncadd (%p1407_p0), %s202_s12, 4294967232  ;;  %p1408_p1 = scmp.eq.s32.totalorder %s1158_s19, 0 }
  0x56   : > { %1073 = dma.done.wait (%p1408_p1), [#allocation6], 512   ;;  %p1409_p11 = pmov %p1408_p1 }
  0x57   : > { %v1104_v0 = vmov 0   ;;  %v928_v1 = vld [vmem:[#allocation5 + $0x4] ss:$8 sps:$4 sm:$0xff]   ;;  %v930_v2 = vld [vmem:[#allocation5] ss:$8 sps:$4 sm:$0xff]   ;;  %vm277_vm0 = vcmask 261120   ;;  %v247_v7 = vlaneseq }
  0x58   : > { %1075 = vsyncadd (%p1409_p11), [#allocation6], 4294966784  ;;  %313 = vmatprep.mubr.bf16.mxu0 %v1104_v0  ;;  %281 = vmatprep.subr.bf16.mxu0 %v928_v1  ;;  %v931_v3 = vld [vmem:[#allocation5 + $0x14] ss:$8 sps:$4 sm:$0xff]   ;;  %v933_v4 = vld [vmem:[#allocation5 + $0x10] ss:$8 sps:$4 sm:$0xff]  }
  0x59   : > { %282 = vmatpush1.bf16.msra.mxu0 %v930_v2  ;;  %v240_v5 = vld [vmem:[%s205_s13] sm:$0xf]  ;;  %v1105_v6 = vmov 0.0   ;;  %s1106_s21 = smov 112   ;;  %v248_v8 = vshrl.u32 %v247_v7, 7  ;;  %v1107_v12 = vmov 0.0|0.0  }
  0x5a   : > { %283 = vmatprep.subr.bf16.mxu0 %v931_v3  ;;  %427 = vrot.lane.b32.xlu1 %v1105_v6, %s1106_s21  ;;  %v245_v10 = vld [vmem:[%s1393_s2] sm:$0x3]  ;;  %s1108_s28 = smov 120   ;;  %vm1109_vm1 = vmmov 0   ;;  %vm328_vm2 = vcmask 64512   ;;  %vm429_vm4 = vcmask 916480  }
  0x5b   : > { %v249_v9 = vsub.s32 0, %v248_v8  ;;  %v253_v11 = vsub.s32 1, %v248_v8  ;;  %792 = vmatprep.subr.bf16.mxu1 %v1107_v12  ;;  %754 = vmatprep.mubr.msk.f32.mxu1 %vm1109_vm1, %v1105_v6  ;;  %vm1290_vm3 = vmpackc.low %vm328_vm2, %vm328_vm2  ;;  %s658_s29 = sshll.u32 %s1273_s25, 3  ;;  %s684_s14 = sshll.u32 %s1158_s19, 7 }
  0x5c   : > { %s238_s10 = scalar_lea.vmem [#allocation8], %s658_s29  ;;  %s1320_s5 = scalar_lea.hbm %s1395_s4, %s684_s14 }
  0x5d   : > { %284 = vmatpush1.bf16.msra.mxu0 %v933_v4  ;;  %v250_v13 = vrot.slane %v245_v10, %v249_v9  ;;  %v254_v14 = vrot.slane %v245_v10, %v253_v11  ;;  %s537_s7 = sshll.u32 %s238_s10, 4  ;;  %s511_s26 = scalar_lea.sflag [#allocation9], %s1273_s25  ;;  %s538_s7 = int_to_ptr.vmem [resolvable:$true] %s537_s7 }
  0x5e   : > { %824 = vmatprep.subr.bf16.mxu0 %v1107_v12  ;;  %s996_s8 = scalar_lea.vmem %s538_s7, 128  ;;  %s1110_s11 = smov [#allocation8]  }
  0x5f   : > { %p997_p4 = scmp.ne.s32.totalorder %s538_s7, %s996_s8  ;;  %s1000_s12 = sshll.u32 %s1110_s11, 4  ;;  %s1001_s12 = int_to_ptr.vmem [resolvable:$false] %s1000_s12 }
  0x60   : > { %664 = vmatmul.mubr.msk.bf16.vlgmr.msra.gmra.mrb[0].mxu0 %vm277_vm0, %v240_v5  ;;  %s1002_s13 = scalar_lea.vmem %s1001_s12, 256  ;;  %p1003_p10 = scmp.lt.s32.totalorder %s538_s7, %s1001_s12 }
  0x61   : > { %789 = vmatprep.mubr.msk.f32.mxu0 %vm1109_vm1, %v1105_v6  ;;  %p998_p6 = pnand %p997_p4, %p1228_p12  ;;  %p1004_p13 = scmp.lt.s32.totalorder %s1002_s13, %s996_s8 }
  0x63   : > { %p999_p8 = pneg %p998_p6  ;;  %p1005_p3 = por %p1004_p13, %p1003_p10 }
  0x65   : > { %p1006_p7 = pnand %p1005_p3, %p999_p8 }
  0xcc   : > { %v428_v31 = vpop.permute.xlu1 %427 }
  0xcd   : > { %v828_v34 = vpack.c.bf16 %v428_v31, %v428_v31 }
 0x133   : > { %v315_v15 = vpop.f32.mrb[0].mxu0 }
 0x134   : > { %v316_v16 = vadd.f32 %v315_v15, %v250_v13  ;;  %v317_v17 = vpop.f32.mrb[1].mxu0 }
 0x135   : > { %v319_v18 = vpop.f32.mrb[2].mxu0  ;;  %v318_v19 = vadd.f32 %v317_v17, %v254_v14 }
 0x136   : > { %v320_v20 = vpop.f32.mrb[3].mxu0  ;;  %v918_v21 = vpack.i.bf16 %v1105_v6, %v316_v16 }
 0x137   : > { %v923_v22 = vpack.i.bf16 %v318_v19, %v316_v16 }
 0x138   : > { %919 = vrot.lane.b32.xlu0 %v918_v21, %s1108_s28 }
 0x13c   : > { %924 = vrot.lane.b32.xlu0 %v923_v22, %s1106_s21 }
 0x1aa   : > { %v920_v23 = vpop.permute.xlu0 %919 }
 0x1ab   : > { %v922_v24 = vunpack.i.h.bf16 %v920_v23  ;;  %v921_v25 = vunpack.i.l.bf16 %v920_v23 }
 0x1ad   : > { %v793_v27 = vpack.c.bf16 %v922_v24, %v921_v25  ;;  %v797_v35 = vpack.c.bf16 %v922_v24, %v922_v24 }
 0x1ae   : > { %v925_v28 = vpop.permute.xlu0 %924 }
 0x1af   : > { %v927_v29 = vunpack.i.h.bf16 %v925_v28  ;;  %v926_v30 = vunpack.i.l.bf16 %v925_v28  ;;  %795 = vmatpush3.bf16.xpose.msk.msra.mxu1 %vm1290_vm3, %v793_v27 }
 0x1b0   : > { %796 = vmatprep.subr.bf16.mxu1 %v1107_v12 }
 0x1b1   : > { %v430_v32 = vsel %vm429_vm4, %v926_v30, %v927_v29 }
 0x1b2   : > { %v825_v33 = vpack.c.bf16 %v428_v31, %v430_v32 }
 0x1b4   : > { %826 = vmatpush3.bf16.msra.mxu0 %v825_v33 }
 0x1b5   : > { %827 = vmatprep.subr.bf16.mxu0 %v1107_v12 }
 0x1b7   : > { %799 = vmatpush3.bf16.xpose.msk.msra.mxu1 %vm1290_vm3, %v797_v35 }
 0x1b8   : > { %800 = vmatprep.subr.bf16.mxu1 %v1107_v12  ;;  %829 = vmatpush3.bf16.msra.mxu0 %v828_v34 }
 0x1b9   : > { %830 = vmatprep.subr.bf16.mxu0 %v1107_v12 }
 0x1bc   : > { %832 = vmatpush3.bf16.msra.mxu0 %v828_v34 }
 0x1bd   : > { %833 = vmatprep.subr.bf16.mxu0 %v1107_v12 }
 0x1bf   : > { %803 = vmatpush3.bf16.xpose.msk.msra.mxu1 %vm1290_vm3, %v797_v35 }
 0x1c0   : > { %804 = vmatprep.subr.bf16.mxu1 %v1107_v12  ;;  %835 = vmatpush3.bf16.msra.mxu0 %v828_v34 }
 0x1c1   : > { %836 = vmatprep.subr.bf16.mxu0 %v1107_v12 }
 0x1c4   : > { %838 = vmatpush3.bf16.msra.mxu0 %v828_v34 }
 0x1c5   : > { %839 = vmatprep.subr.bf16.mxu0 %v1107_v12 }
 0x1c7   : > { %807 = vmatpush3.bf16.xpose.msk.msra.mxu1 %vm1290_vm3, %v797_v35 }
 0x1c8   : > { %808 = vmatprep.subr.bf16.mxu1 %v1107_v12  ;;  %841 = vmatpush3.bf16.msra.mxu0 %v828_v34 }
 0x1c9   : > { %842 = vmatprep.subr.bf16.mxu0 %v1107_v12 }
 0x1cc   : > { %844 = vmatpush3.bf16.msra.mxu0 %v828_v34 }
 0x1cd   : > { %845 = vmatprep.subr.bf16.mxu0 %v1107_v12 }
 0x1cf   : > { %811 = vmatpush3.bf16.xpose.msk.msra.mxu1 %vm1290_vm3, %v797_v35 }
 0x1d0   : > { %812 = vmatprep.subr.bf16.mxu1 %v1107_v12  ;;  %847 = vmatpush3.bf16.msra.mxu0 %v828_v34 }
 0x1d7   : > { %815 = vmatpush3.bf16.xpose.msk.msra.mxu1 %vm1290_vm3, %v797_v35 }
 0x1d8   : > { %816 = vmatprep.subr.bf16.mxu1 %v1107_v12 }
 0x1df   : > { %819 = vmatpush3.bf16.xpose.msk.msra.mxu1 %vm1290_vm3, %v797_v35 }
 0x1e0   : > { %820 = vmatprep.subr.bf16.mxu1 %v1107_v12 }
 0x1e7   : > { %823 = vmatpush3.bf16.xpose.msk.msra.mxu1 %vm1290_vm3, %v797_v35 }
 0x1ee   : > { %755 = vmatmul.mubr.msk.f32.vlgmr.msra.gmra.mrb[0].mxu1 %vm328_vm2, %v316_v16 }
 0x2c1   : > { %v401_v36 = vpop.f32.mrb[0].mxu1 }
 0x2c2   : > { %v405_v37 = vrot.slane %v401_v36, 4  ;;  %v756_v38 = vpop.f32.mrb[1].mxu1 }
 0x2c4   : > { %v406_v39 = vmax.f32 %v401_v36, %v405_v37 }
 0x2c6   : > { %v407_v40 = vrot.slane %v406_v39, 2 }
 0x2c8   : > { %v408_v41 = vmax.f32 %v406_v39, %v407_v40 }
 0x2ca   : > { %v409_v42 = vrot.slane %v408_v41, 1 }
 0x2cc   : > { %v410_v43 = vmax.f32 %v408_v41, %v409_v42 }
 0x2ce   : > { %v411_v44 = vsub.f32 %v401_v36, %v410_v43 }
 0x2d0   : > { %v412_v45 = vmul.f32 1.442695, %v411_v44 }
 0x2d2   : > { %934 = vpow2.f32 %v412_v45 }
 0x2dc   : > { %v935_v46 = vpop.eup %934 }
 0x2dd   : > { %v414_v47 = vrot.slane %v935_v46, 4 }
 0x2df   : > { %v415_v48 = vadd.f32 %v935_v46, %v414_v47 }
 0x2e1   : > { %v416_v49 = vrot.slane %v415_v48, 2 }
 0x2e3   : > { %v417_v50 = vadd.f32 %v416_v49, %v415_v48 }
 0x2e5   : > { %v418_v51 = vrot.slane %v417_v50, 1 }
 0x2e7   : > { %v419_v52 = vadd.f32 %v418_v51, %v417_v50 }
 0x2e9   : > { %936 = vrcp.f32 %v419_v52 }
 0x2f3   : > { %v937_v53 = vpop.eup %936 }
 0x2f4   : > { %v421_v54 = vmul.f32 %v937_v53, %v935_v46 }
 0x2f6   : > { %790 = vmatmul.mubr.f32.vlgmr.msra.gmra.mrb[4].mxu0 %v421_v54  ;;  %504 = vst [vmem:[%s238_s10] sm:$0xff] %v421_v54 }
 0x2f7   : > { %1009 = shalt.err (!%p1006_p7)
}
 0x2f8   : > { %s1010_s21 = scalar_lea.hbm %s1320_s5, 128  ;;  %s1014_s28 = scalar_lea.hbm %s1395_s4, 256 }
 0x2f9   : > { %p1011_p9 = scmp.ne.s32.totalorder %s1320_s5, %s1010_s21  ;;  %p1015_p0 = scmp.lt.u32.totalorder %s1320_s5, %s1395_s4 }
 0x2fa   : > { %p1016_p1 = scmp.lt.u32.totalorder %s1014_s28, %s1010_s21  ;;  %p1018_p4 = scmp.lt.u32.totalorder %s1010_s21, %s1320_s5 }
 0x2fb   : > { %p1012_p2 = pnand %p1011_p9, %p1228_p12 }
 0x2fc   : > { %p1017_p11 = por %p1016_p1, %p1015_p0 }
 0x2fd   : > { %p1013_p5 = pneg %p1012_p2 }
 0x2fe   : > { %p1019_p6 = por %p1018_p4, %p1017_p11 }
 0x300   : > { %p1020_p8 = pnand %p1019_p6, %p1013_p5 }
 0x302   : > { %1023 = shalt.err (!%p1020_p8)
}
 0x303   : > { %855 = dma.vmem_to_hbm [thread:$0]  (%p1228_p12), %s538_s7, 128, %s1320_s5, %s511_s26  }
 0x304   : > { %s231_s6 = scalar_lea.vmem [#allocation7], %s658_s29  ;;  %s1349_s13 = scalar_lea.hbm %s1394_s3, %s684_s14 }
 0x305   : > { %s524_s8 = sshll.u32 %s231_s6, 4  ;;  %s506_s21 = scalar_lea.sflag [#allocation4], %s1273_s25  ;;  %s1342_s8 = int_to_ptr.vmem [resolvable:$true] %s524_s8 }
 0x306   : > { %s1024_s23 = scalar_lea.vmem %s1342_s8, 128  ;;  %s1111_s29 = smov [#allocation7]  }
 0x307   : > { %p1025_p10 = scmp.ne.s32.totalorder %s1342_s8, %s1024_s23  ;;  %s1028_s5 = sshll.u32 %s1111_s29, 4  ;;  %s1029_s5 = int_to_ptr.vmem [resolvable:$false] %s1028_s5 }
 0x308   : > { %s1030_s19 = scalar_lea.vmem %s1029_s5, 256  ;;  %p1031_p7 = scmp.lt.s32.totalorder %s1342_s8, %s1029_s5 }
 0x309   : > { %p1026_p13 = pnand %p1025_p10, %p1228_p12  ;;  %p1032_p9 = scmp.lt.s32.totalorder %s1030_s19, %s1024_s23 }
 0x30b   : > { %p1027_p3 = pneg %p1026_p13  ;;  %p1033_p2 = por %p1032_p9, %p1031_p7 }
 0x30d   : > { %p1034_p5 = pnand %p1033_p2, %p1027_p3 }
 0x3c9   : > { %v499_v55 = vpop.f32.mrb[4].mxu0 }
 0x3ca   : > { %503 = vst [vmem:[%s231_s6] sm:$0xff] %v499_v55  ;;  %v791_v56 = vpop.f32.mrb[5].mxu0 }
 0x3cb   : > { %1037 = shalt.err (!%p1034_p5)
}
 0x3cc   : > { %s1038_s25 = scalar_lea.hbm %s1349_s13, 128  ;;  %s1042_s26 = scalar_lea.hbm %s1394_s3, 256 }
 0x3cd   : > { %p1039_p0 = scmp.ne.s32.totalorder %s1349_s13, %s1038_s25  ;;  %p1043_p4 = scmp.lt.u32.totalorder %s1349_s13, %s1394_s3 }
 0x3ce   : > { %p1044_p6 = scmp.lt.u32.totalorder %s1042_s26, %s1038_s25  ;;  %p1046_p10 = scmp.lt.u32.totalorder %s1038_s25, %s1349_s13 }
 0x3cf   : > { %p1040_p1 = pnand %p1039_p0, %p1228_p12 }
 0x3d0   : > { %p1045_p8 = por %p1044_p6, %p1043_p4 }
 0x3d1   : > { %p1041_p11 = pneg %p1040_p1 }
 0x3d2   : > { %p1047_p13 = por %p1046_p10, %p1045_p8 }
 0x3d4   : > { %p1048_p3 = pnand %p1047_p13, %p1041_p11 }
 0x3d6   : > { %1051 = shalt.err (!%p1048_p3)
}
 0x3d7   : > { %854 = dma.vmem_to_hbm [thread:$0]  (%p1228_p12), %s1342_s8, 128, %s1349_s13, %s506_s21  }
 0x3d8 PF: > { %s549_s10 = sand.u32 1, %s1086_s15   ;;  %p1412_p7 = scmp.ne.s32.totalorder %s1400_s22, 0 }
 0x3d9   : > { %p1413_p9 = scmp.ge.s32.totalorder %s1098_s18, 2  ;;  %s550_s20 = scalar_lea.sflag [#allocation4], %s549_s10 }
 0x3db   : > { %p867_p2 = pnand %p1413_p9, %p1412_p7 }
 0x3dd   : > { %1077 = dma.done.wait (!%p867_p2), %s550_s20, 128  }
 0x3de   : > { %1079 = vsyncadd (!%p867_p2), %s550_s20, 4294967168  ;;  %s559_s6 = scalar_lea.sflag [#allocation9], %s549_s10 }
 0x3df   : > { %1081 = dma.done.wait (!%p867_p2), %s559_s6, 128  }
 0x3e0   : > { %1083 = vsyncadd (!%p867_p2), %s559_s6, 4294967168  ;;  %p22_p12 = scmp.ge.s32.totalorder %s1193_s27, 4   ;;  %s1414_s15 = smov %s1090_s16 }
 0x3e1   : > { %s1415_s16 = smov %s1094_s17  ;;  %s1416_s17 = smov %s1224_s24 }
 0x3e2   : > { %s1417_s18 = smov %s1193_s27  ;;  %24 = sbr.rel (!%p22_p12) target bundleno = 8 (0x8), region = 98 }
 0x3e9   :  { %564 = vsyncpa [#allocation3], 1 }
 0x3ea   :  { %566 = vsyncpa [#allocation3 + $0x1], 1 }
 0x3eb   :  { %567 = vsyncpa [#allocation6], 1 }
 0x3ec   :  { %568 = vsyncpa [#allocation4], 1 }
 0x3ed   :  { %570 = vsyncpa [#allocation4 + $0x1], 1 }
 0x3ee   :  { %571 = vsyncpa [#allocation9], 1 }
 0x3ef   :  { %573 = vsyncpa [#allocation9 + $0x1], 1 }

</bundles_post_ra>
